<compile_context>
chip_gen: v6e
topology: v6e:2x2x1
jax: 0.10.0
libtpu: 0.0.40
codegen_flags: <defaults>
</compile_context>

<pallas_src>
import jax
import jax.numpy as jnp
from jax.experimental import pallas as pl
from jax.experimental.pallas import tpu as pltpu

KH = KW = 3
STRIDE = 2
SUBLANE = 8
MAX_TM = 512            # rows of im2col patches per grid step


def _round_up(x, m):
    return (x + m - 1) // m * m


def _gemm_bias_kernel(p_ref, w_ref, b_ref, o_ref):
    # p_ref: (TM, K)    im2col patch rows (K = 9*Cin, full-extent last dim)
    # w_ref: (K, Cout)  folded 3x3 conv weight, resident across grid steps
    # b_ref: (1, Cout)  bias (f32), resident
    # o_ref: (TM, Cout) output rows
    acc = jnp.dot(p_ref[...], w_ref[...], preferred_element_type=jnp.float32)
    o_ref[...] = (acc + b_ref[...]).astype(o_ref.dtype)


def residual_down(x_nchw, weight_oihw, bias, *, compute_dtype=None):
    """Replicate-pad (right/bottom by 1) + Conv2d(kernel=3, stride=2).

    x_nchw: (N, Cin, H, W); weight_oihw: (Cout, Cin, 3, 3); bias: (Cout,).
    compute_dtype: dtype of the MXU operands (None -> x dtype).  bfloat16
    halves HBM read traffic on v6e/v7x; accumulation is always f32.
    """
    n, cin, h, w = x_nchw.shape
    cout = weight_oihw.shape[0]
    hp, wp = h + 1, w + 1
    oh = (hp - KH) // STRIDE + 1
    ow = (wp - KW) // STRIDE + 1

    k = KH * KW * cin                         # 9 * Cin, NOT padded in HBM
    m_total = n * oh * ow                     # batch folded into M
    tm = min(MAX_TM, _round_up(m_total, SUBLANE))
    m_pad = _round_up(m_total, tm)
    num_tiles = m_pad // tm

    operand_dtype = x_nchw.dtype if compute_dtype is None else compute_dtype

    # ---- wrapper-side layout plumbing (pad + stride-2 slices + concat fuse
    #      into one HBM im2col buffer; nothing here is compute) ---------------
    x_nhwc = jnp.transpose(x_nchw, (0, 2, 3, 1))
    xpad = jnp.pad(x_nhwc, ((0, 0), (0, 1), (0, 1), (0, 0)), mode="edge")
    taps = []
    for kh in range(KH):
        for kw in range(KW):
            taps.append(xpad[:, kh:kh + STRIDE * oh:STRIDE,
                             kw:kw + STRIDE * ow:STRIDE, :])        # (N,OH,OW,Cin)
    patches = jnp.concatenate(taps, axis=-1).reshape(m_total, k)    # (N*OH*OW, 9*Cin)
    patches = jnp.pad(patches, ((0, m_pad - m_total), (0, 0)))
    patches = patches.astype(operand_dtype)

    # Weight folded to (9*Cin, Cout) in the same (kh, kw, cin) order as patches.
    w_k = (jnp.transpose(weight_oihw, (2, 3, 1, 0))
              .reshape(k, cout).astype(operand_dtype))
    b_2d = bias.reshape(1, cout).astype(jnp.float32)

    flops = 2 * m_total * k * cout
    bytes_accessed = (patches.size * patches.dtype.itemsize
                      + w_k.size * w_k.dtype.itemsize
                      + b_2d.size * 4
                      + m_pad * cout * jnp.dtype(x_nchw.dtype).itemsize)

    out_pad = pl.pallas_call(
        _gemm_bias_kernel,
        out_shape=jax.ShapeDtypeStruct((m_pad, cout), x_nchw.dtype),
        grid_spec=pltpu.PrefetchScalarGridSpec(
            num_scalar_prefetch=0,
            grid=(num_tiles,),
            in_specs=[
                pl.BlockSpec((tm, k), lambda i: (i, 0)),      # patches: M-tiled
                pl.BlockSpec((k, cout), lambda i: (0, 0)),    # weight: resident
                pl.BlockSpec((1, cout), lambda i: (0, 0)),    # bias: resident
            ],
            out_specs=pl.BlockSpec((tm, cout), lambda i: (i, 0)),
        ),
        compiler_params=pltpu.CompilerParams(
            dimension_semantics=("parallel",),
            vmem_limit_bytes=32 * 1024 * 1024,   # comfortable on v5e/v6e/v7x
        ),
        cost_estimate=pl.CostEstimate(
            flops=flops, transcendentals=0, bytes_accessed=bytes_accessed),
    )(patches, w_k, b_2d)

    out = out_pad[:m_total].reshape(n, oh, ow, cout)   # drop M padding rows
    return jnp.transpose(out, (0, 3, 1, 2))            # back to NCHW


if __name__ == "__main__":
    # Small shapes consistent with the module: batch=2, Cin=4, H=W=16, Cout=8.
    key = jax.random.PRNGKey(0)
    k_x, k_w, k_b = jax.random.split(key, 3)

    N, CIN, H, W = 2, 4, 16, 16
    COUT = 8

    x = jax.random.normal(k_x, (N, CIN, H, W), dtype=jnp.float32)
    fan_in = CIN * KH * KW
    bound = 1.0 / (fan_in ** 0.5)
    weight = jax.random.uniform(k_w, (COUT, CIN, KH, KW),
                                minval=-bound, maxval=bound, dtype=jnp.float32)
    bias = jax.random.uniform(k_b, (COUT,),
                              minval=-bound, maxval=bound, dtype=jnp.float32)

    # Reference: XLA conv on the same replicate-padded input (PyTorch semantics).
    x_nhwc = jnp.transpose(x, (0, 2, 3, 1))
    xpad = jnp.pad(x_nhwc, ((0, 0), (0, 1), (0, 1), (0, 0)), mode="edge")
    ref = jax.lax.conv_general_dilated(
        xpad, jnp.transpose(weight, (2, 3, 1, 0)),
        window_strides=(STRIDE, STRIDE), padding="VALID",
        dimension_numbers=("NHWC", "HWIO", "NHWC"),
    ) + bias[None, None, None, :]
    ref = jnp.transpose(ref, (0, 3, 1, 2))

    # f32 operand path: matches the PyTorch module's numerics.
    fn_f32 = jax.jit(residual_down)
    y = jax.block_until_ready(fn_f32(x, weight, bias))
    assert y.shape == (N, COUT, 8, 8), y.shape
    assert jnp.allclose(y, ref, atol=1e-4, rtol=1e-4), "f32 mismatch vs XLA conv"

    # bf16 operand path (v6e/v7x HBM saver): f32 accumulation, looser tolerance.
    fn_bf16 = jax.jit(
        lambda a, b, c: residual_down(a, b, c, compute_dtype=jnp.bfloat16))
    y_bf16 = jax.block_until_ready(fn_bf16(x, weight, bias))
    assert jnp.allclose(y_bf16, ref, atol=3e-2, rtol=3e-2), "bf16 mismatch vs XLA conv"

    print("KERNEL_OK")
</pallas_src>

<mosaic_0001>
module attributes {stable_mosaic.version = 11 : i64} {
  func.func @_gemm_bias_kernel(%arg0: i32, %arg1: memref<128x36xf32, #tpu.memory_space<vmem>>, %arg2: memref<36x8xf32, #tpu.memory_space<vmem>>, %arg3: memref<1x8xf32, #tpu.memory_space<vmem>>, %arg4: memref<128x8xf32, #tpu.memory_space<vmem>>) attributes {dimension_semantics = [#tpu.dimension_semantics<parallel>], iteration_bounds = array<i64: 1>, scalar_prefetch = 0 : i64, scratch_operands = 0 : i64, tpu.core_type = #tpu.core_type<tc>, window_params = [{transform_indices = @transform_0, window_bounds = array<i64: 128, 36>}, {pipeline_mode = #tpu.pipeline_mode<synchronous>, transform_indices = @transform_1, window_bounds = array<i64: 36, 8>}, {pipeline_mode = #tpu.pipeline_mode<synchronous>, transform_indices = @transform_2, window_bounds = array<i64: 1, 8>}, {transform_indices = @transform_3, window_bounds = array<i64: 128, 8>}]} {
    %c0 = arith.constant 0 : index
    %c0_0 = arith.constant 0 : index
    %0 = vector.load %arg1[%c0, %c0_0] : memref<128x36xf32, #tpu.memory_space<vmem>>, vector<128x36xf32>
    %c0_1 = arith.constant 0 : index
    %c0_2 = arith.constant 0 : index
    %1 = vector.load %arg2[%c0_1, %c0_2] : memref<36x8xf32, #tpu.memory_space<vmem>>, vector<36x8xf32>
    %cst = arith.constant dense<0.000000e+00> : vector<128x8xf32>
    %2 = tpu.matmul %0, %1, %cst {dimension_numbers = #tpu.dot_dimension_numbers<[1], [0], [0], [1], [0, 0, 1, 1], [], []>} : vector<128x36xf32>, vector<36x8xf32>, vector<128x8xf32> -> vector<128x8xf32>
    %c0_3 = arith.constant 0 : index
    %c0_4 = arith.constant 0 : index
    %3 = vector.load %arg3[%c0_3, %c0_4] : memref<1x8xf32, #tpu.memory_space<vmem>>, vector<1x8xf32>
    %4 = vector.broadcast %3 : vector<1x8xf32> to vector<128x8xf32>
    %5 = arith.addf %2, %4 : vector<128x8xf32>
    %c0_5 = arith.constant 0 : index
    %c0_6 = arith.constant 0 : index
    %6 = vector.load %arg4[%c0_5, %c0_6] : memref<128x8xf32, #tpu.memory_space<vmem>>, vector<128x8xf32>
    tpu.vector_store %arg4[%c0_5, %c0_6], %5 {strides = array<i32>} : memref<128x8xf32, #tpu.memory_space<vmem>>, vector<128x8xf32>,
    return
  }
  func.func @transform_0(%arg0: i32) -> (i32, i32) {
    %c0_i32 = arith.constant 0 : i32
    %c0_i32_0 = arith.constant 0 : i32
    return %arg0, %c0_i32 : i32, i32
  }
  func.func @transform_1(%arg0: i32) -> (i32, i32) {
    %c0_i32 = arith.constant 0 : i32
    %c0_i32_0 = arith.constant 0 : i32
    %c0_i32_1 = arith.constant 0 : i32
    return %c0_i32, %c0_i32_0 : i32, i32
  }
  func.func @transform_2(%arg0: i32) -> (i32, i32) {
    %c0_i32 = arith.constant 0 : i32
    %c0_i32_0 = arith.constant 0 : i32
    %c0_i32_1 = arith.constant 0 : i32
    return %c0_i32, %c0_i32_0 : i32, i32
  }
  func.func @transform_3(%arg0: i32) -> (i32, i32) {
    %c0_i32 = arith.constant 0 : i32
    %c0_i32_0 = arith.constant 0 : i32
    return %arg0, %c0_i32 : i32, i32
  }
}

</mosaic_0001>

<bundles_post_ra>
// kernel: residual_down.1
= control target key start
LH: loop header
LB: loop body
LE: loop exit
PB: predicated region body
PF: predicated region fallthrough
CT: control target
= control target key end

     0   :  { %vm91_vm0 = vcmask 1043456   ;;  %vm42_vm1 = vcmask 293888   ;;  %vm240_vm2 = vcmask 64512   ;;  %s510_s1 = inlined_call_operand.vmem [shape: f32[36,8], index: 1, kind: input, shape index: {}]   ;;  %s511_s0 = inlined_call_operand.vmem [shape: f32[128,36], index: 0, kind: input, shape index: {}]   ;;  %s512_s2 = inlined_call_operand.vmem [shape: f32[1,8], index: 2, kind: input, shape index: {}]   ;;  %s513_s3 = inlined_call_operand.vmem [shape: f32[128,8], index: 3, kind: output, shape index: {}]  }
   0x1   :  { %v34_v0 = vld [vmem:[%s510_s1 + $0x20] sm:$0xf]  ;;  %v33_v1 = vld [vmem:[%s510_s1 + $0x18] sm:$0xff]  ;;  %v32_v2 = vld [vmem:[%s510_s1 + $0x10] sm:$0xff] }
   0x2   :  { %300 = vmatprep.subr.msk.mxu0 %vm91_vm0, %v34_v0  ;;  %334 = vmatprep.subr.msk.mxu1 %vm91_vm0, %v34_v0  ;;  %v31_v3 = vld [vmem:[%s510_s1 + $0x8] sm:$0xff]  ;;  %v30_v4 = vld [vmem:[%s510_s1] sm:$0xff]  ;;  %v16_v9 = vld [vmem:[%s511_s0 + $0x10] sm:$0xff] }
   0x3   :  { %301 = vmatpush3.msk.msra.mxu0 %vm91_vm0, %v34_v0  ;;  %339 = vmatpush3.msk.msra.mxu1 %vm91_vm0, %v34_v0  ;;  %v14_v5 = vld [vmem:[%s511_s0] sm:$0xff]  ;;  %v15_v7 = vld [vmem:[%s511_s0 + $0x8] sm:$0xff]  ;;  %v24_v10 = vld [vmem:[%s511_s0 + $0x50] sm:$0xff] }
   0x4   :  { %302 = vmatprep.subr.mxu0 %v33_v1  ;;  %335 = vmatprep.subr.mxu1 %v33_v1  ;;  %v22_v6 = vld [vmem:[%s511_s0 + $0x40] sm:$0xff]  ;;  %v23_v8 = vld [vmem:[%s511_s0 + $0x48] sm:$0xff]  ;;  %v17_v11 = vld [vmem:[%s511_s0 + $0x18] sm:$0xff] }
   0x5   :  { %303 = vmatpush3.msra.mxu0 %v33_v1  ;;  %340 = vmatpush3.msra.mxu1 %v33_v1  ;;  %v25_v12 = vld [vmem:[%s511_s0 + $0x58] sm:$0xff]  ;;  %v18_v13 = vld [vmem:[%s511_s0 + $0x20] sm:$0xff]  ;;  %v19_v15 = vld [vmem:[%s511_s0 + $0x28] sm:$0xff] }
   0x6   :  { %304 = vmatprep.subr.mxu0 %v32_v2  ;;  %336 = vmatprep.subr.mxu1 %v32_v2  ;;  %v26_v14 = vld [vmem:[%s511_s0 + $0x60] sm:$0xff]  ;;  %v27_v16 = vld [vmem:[%s511_s0 + $0x68] sm:$0xff]  ;;  %v20_v17 = vld [vmem:[%s511_s0 + $0x30] sm:$0xff] }
   0x7   :  { %305 = vmatpush3.msra.mxu0 %v32_v2  ;;  %341 = vmatpush3.msra.mxu1 %v32_v2  ;;  %v28_v18 = vld [vmem:[%s511_s0 + $0x70] sm:$0xff]  ;;  %v21_v19 = vld [vmem:[%s511_s0 + $0x38] sm:$0xff]  ;;  %v261_v21 = vld [vmem:[%s512_s2] ss:$0 sm:$0xff] }
   0x8   :  { %306 = vmatprep.subr.mxu0 %v31_v3  ;;  %337 = vmatprep.subr.mxu1 %v31_v3  ;;  %v29_v20 = vld [vmem:[%s511_s0 + $0x78] sm:$0xff] }
   0x9   :  { %307 = vmatpush3.msra.mxu0 %v31_v3  ;;  %342 = vmatpush3.msra.mxu1 %v31_v3 }
   0xa   :  { %308 = vmatprep.subr.mxu0 %v30_v4  ;;  %338 = vmatprep.subr.mxu1 %v30_v4 }
   0xb   :  { %309 = vmatpush3.msra.mxu0 %v30_v4  ;;  %343 = vmatpush3.msra.mxu1 %v30_v4 }
   0xc   :  { %310 = vmatprep.mubr.msk.f32.mxu0 %vm42_vm1, %v14_v5  ;;  %322 = vmatprep.mubr.msk.f32.mxu1 %vm42_vm1, %v22_v6 }
   0xd   :  { %311 = vmatmul.mubr.msk.f32.vlgmr.msra.gmra.mxu0 %vm42_vm1, %v15_v7  ;;  %323 = vmatmul.mubr.msk.f32.vlgmr.msra.gmra.mxu1 %vm42_vm1, %v23_v8 }
   0xe   :  { %313 = vmatprep.mubr.msk.f32.mxu0 %vm42_vm1, %v16_v9  ;;  %325 = vmatprep.mubr.msk.f32.mxu1 %vm42_vm1, %v24_v10 }
  0x11   :  { %314 = vmatmul.mubr.msk.f32.gmra.mxu0 %vm42_vm1, %v17_v11  ;;  %326 = vmatmul.mubr.msk.f32.gmra.mxu1 %vm42_vm1, %v25_v12 }
  0x12   :  { %316 = vmatprep.mubr.msk.f32.mxu0 %vm42_vm1, %v18_v13  ;;  %328 = vmatprep.mubr.msk.f32.mxu1 %vm42_vm1, %v26_v14 }
  0x15   :  { %317 = vmatmul.mubr.msk.f32.gmra.mxu0 %vm42_vm1, %v19_v15  ;;  %329 = vmatmul.mubr.msk.f32.gmra.mxu1 %vm42_vm1, %v27_v16 }
  0x16   :  { %319 = vmatprep.mubr.msk.f32.mxu0 %vm42_vm1, %v20_v17  ;;  %331 = vmatprep.mubr.msk.f32.mxu1 %vm42_vm1, %v28_v18 }
  0x19   :  { %320 = vmatmul.mubr.msk.f32.gmra.mxu0 %vm42_vm1, %v21_v19  ;;  %332 = vmatmul.mubr.msk.f32.gmra.mxu1 %vm42_vm1, %v29_v20 }
  0xcd   :  { %v312_v22 = vpop.f32.mrf.mxu0  ;;  %v324_v23 = vpop.f32.mrf.mxu1 }
  0xce   :  { %v167_v24 = vadd.f32 %v312_v22, %v261_v21  ;;  %v207_v25 = vadd.f32 %v324_v23, %v261_v21 }
  0xcf   :  { %v161_v26 = vpop.f32.mrf.mxu0  ;;  %v201_v27 = vpop.f32.mrf.mxu1 }
  0xd0   :  { %242 = vst.msk [vmem:[%s513_s3 + $0x8] sm:$0xff] %vm240_vm2, %v167_v24  ;;  %250 = vst.msk [vmem:[%s513_s3 + $0x48] sm:$0xff] %vm240_vm2, %v207_v25  ;;  %v162_v28 = vadd.f32 %v261_v21, %v161_v26  ;;  %v202_v29 = vadd.f32 %v261_v21, %v201_v27 }
  0xd1   :  { %v315_v30 = vpop.f32.mrf.mxu0  ;;  %v327_v31 = vpop.f32.mrf.mxu1 }
  0xd2   :  { %241 = vst.msk [vmem:[%s513_s3] sm:$0xff] %vm240_vm2, %v162_v28  ;;  %249 = vst.msk [vmem:[%s513_s3 + $0x40] sm:$0xff] %vm240_vm2, %v202_v29  ;;  %v177_v32 = vadd.f32 %v315_v30, %v261_v21  ;;  %v217_v33 = vadd.f32 %v327_v31, %v261_v21 }
  0xd3   :  { %v171_v34 = vpop.f32.mrf.mxu0  ;;  %v211_v35 = vpop.f32.mrf.mxu1 }
  0xd4   :  { %244 = vst.msk [vmem:[%s513_s3 + $0x18] sm:$0xff] %vm240_vm2, %v177_v32  ;;  %252 = vst.msk [vmem:[%s513_s3 + $0x58] sm:$0xff] %vm240_vm2, %v217_v33  ;;  %v172_v36 = vadd.f32 %v261_v21, %v171_v34  ;;  %v212_v37 = vadd.f32 %v261_v21, %v211_v35 }
  0xd5   :  { %v318_v38 = vpop.f32.mrf.mxu0  ;;  %v330_v39 = vpop.f32.mrf.mxu1 }
  0xd6   :  { %243 = vst.msk [vmem:[%s513_s3 + $0x10] sm:$0xff] %vm240_vm2, %v172_v36  ;;  %251 = vst.msk [vmem:[%s513_s3 + $0x50] sm:$0xff] %vm240_vm2, %v212_v37  ;;  %v187_v40 = vadd.f32 %v318_v38, %v261_v21  ;;  %v227_v41 = vadd.f32 %v330_v39, %v261_v21 }
  0xd7   :  { %v181_v42 = vpop.f32.mrf.mxu0  ;;  %v221_v43 = vpop.f32.mrf.mxu1 }
  0xd8   :  { %246 = vst.msk [vmem:[%s513_s3 + $0x28] sm:$0xff] %vm240_vm2, %v187_v40  ;;  %254 = vst.msk [vmem:[%s513_s3 + $0x68] sm:$0xff] %vm240_vm2, %v227_v41  ;;  %v182_v44 = vadd.f32 %v261_v21, %v181_v42  ;;  %v222_v45 = vadd.f32 %v261_v21, %v221_v43 }
  0xd9   :  { %v321_v46 = vpop.f32.mrf.mxu0  ;;  %v333_v47 = vpop.f32.mrf.mxu1 }
  0xda   :  { %245 = vst.msk [vmem:[%s513_s3 + $0x20] sm:$0xff] %vm240_vm2, %v182_v44  ;;  %253 = vst.msk [vmem:[%s513_s3 + $0x60] sm:$0xff] %vm240_vm2, %v222_v45  ;;  %v197_v48 = vadd.f32 %v321_v46, %v261_v21  ;;  %v237_v49 = vadd.f32 %v333_v47, %v261_v21 }
  0xdb   :  { %v191_v50 = vpop.f32.mrf.mxu0  ;;  %v231_v51 = vpop.f32.mrf.mxu1 }
  0xdc   :  { %248 = vst.msk [vmem:[%s513_s3 + $0x38] sm:$0xff] %vm240_vm2, %v197_v48  ;;  %256 = vst.msk [vmem:[%s513_s3 + $0x78] sm:$0xff] %vm240_vm2, %v237_v49  ;;  %v192_v52 = vadd.f32 %v261_v21, %v191_v50  ;;  %v232_v53 = vadd.f32 %v261_v21, %v231_v51 }
  0xde   :  { %247 = vst.msk [vmem:[%s513_s3 + $0x30] sm:$0xff] %vm240_vm2, %v192_v52  ;;  %255 = vst.msk [vmem:[%s513_s3 + $0x70] sm:$0xff] %vm240_vm2, %v232_v53 }

</bundles_post_ra>
